<compile_context>
chip_gen: v7x
topology: tpu7x:2x2x1
jax: 0.10.0
libtpu: 0.0.40
codegen_flags: <defaults>
</compile_context>

<pallas_src>
import functools

import jax
import jax.numpy as jnp
from jax.experimental import pallas as pl
from jax.experimental.pallas import tpu as pltpu


def _round_up(x, m):
    return (x + m - 1) // m * m


def _agfnn_kernel(lhat_ref, x_ref, w_ref, b_ref, out_ref, h_ref, *,
                  K, num_layers, f_pad):
    """One grid step = one ChebConv layer.

    lhat_ref: [N, N]             bf16  (-D^-1/2 A D^-1/2, lambda_max = 2), resident
    x_ref:    [N, f_pad]         f32   zero-padded node features, resident
    w_ref:    [1, K*f_pad, f_pad]bf16  this layer's padded Chebyshev weights (streamed)
    b_ref:    [1, 1, f_pad]      f32   this layer's padded bias (streamed)
    out_ref:  [N, f_pad]         f32   written on the last layer only
    h_ref:    [N, f_pad]         f32   scratch: activations carried across layers
    """
    layer = pl.program_id(0)

    @pl.when(layer == 0)
    def _():
        h_ref[...] = x_ref[...]

    lhat = lhat_ref[...]
    h = h_ref[...]                                   # f32 activations
    h_bf16 = h.astype(jnp.bfloat16)

    def w_k(k):                                      # static, tile-aligned slice
        return w_ref[0, k * f_pad:(k + 1) * f_pad, :]

    # Per-order accumulation: acc = sum_k T_k @ W_k   (f32 accumulation).
    acc = jnp.dot(h_bf16, w_k(0), preferred_element_type=jnp.float32)   # T_0 term
    if K > 1:
        t1 = jnp.dot(lhat, h_bf16, preferred_element_type=jnp.float32)  # T_1
        acc = acc + jnp.dot(t1.astype(jnp.bfloat16), w_k(1),
                            preferred_element_type=jnp.float32)
        t_km2, t_km1 = h, t1                         # recursion stays f32
        for k in range(2, K):                        # static unroll over orders
            # Chebyshev factor 2 folded into the small operand (exact in bf16).
            t_k = jnp.dot(lhat, (t_km1 * 2.0).astype(jnp.bfloat16),
                          preferred_element_type=jnp.float32) - t_km2
            acc = acc + jnp.dot(t_k.astype(jnp.bfloat16), w_k(k),
                                preferred_element_type=jnp.float32)
            t_km2, t_km1 = t_km1, t_k

    acc = acc + b_ref[0]                             # [1, f_pad] broadcast over nodes

    @pl.when(layer != num_layers - 1)
    def _():
        h_ref[...] = jnp.maximum(acc, 0.0)           # ReLU between layers

    @pl.when(layer == num_layers - 1)
    def _():
        out_ref[...] = acc.astype(out_ref.dtype)


def _vmem_limit_bytes(N, f_pad, K):
    """Per-generation VMEM limit derived from the actual resident working set."""
    lhat_b = 2 * N * N                         # bf16 lhat, resident (single copy)
    x_b = 4 * N * f_pad                        # f32 features, resident
    w_b = 2 * (2 * K * f_pad * f_pad)          # one layer's bf16 weights, double-buffered
    b_b = 2 * (4 * f_pad)
    out_b = 4 * N * f_pad                      # output block, resident
    h_b = 4 * N * f_pad                        # activation scratch
    live_b = 4 * (4 * N * f_pad)               # f32 temporaries: h, t_km1, t_km2, acc
    need = lhat_b + x_b + w_b + b_b + out_b + h_b + live_b
    need = int(need * 1.25) + (4 << 20)        # headroom for compiler scratch/relayouts
    try:                                       # 128 MiB on v5e/v6e, 64 MiB on v7x
        cap = int(getattr(pltpu.get_tpu_info(), "vmem_capacity_bytes"))
    except Exception:
        cap = 64 << 20                         # conservative fallback (v7x physical)
    return min(int(cap * 7 // 8), max(need, 16 << 20))


def agfnn_forward(lhat, features, params, *, K):
    """AGFNN forward. lhat [N,N], features [N,in_feats],
    params = [(W_l [K*F_in_l, F_out_l], b_l [1, F_out_l]), ...]."""
    N, in_feats = features.shape
    num_layers = len(params)
    out_feats = params[-1][0].shape[1]
    feat_dims = [in_feats] + [w.shape[1] for (w, _) in params]
    # Lane-dense common feature width.  Real widths <= 128 here, so keep 128;
    # only widths >= 129 pay the 256-wide MXU padding (v6e/v7x) via round_up.
    f_pad = _round_up(max(feat_dims), 128)

    # Zero-pad features / params to the common lane-dense width.  Zero padding
    # propagates exactly through the dots, bias add and ReLU.
    x_p = jnp.zeros((N, f_pad), jnp.float32).at[:, :in_feats].set(features)
    w_stack, b_stack = [], []
    for (w, b) in params:
        f_in = w.shape[0] // K
        f_out = w.shape[1]
        w_p = jnp.zeros((K * f_pad, f_pad), jnp.float32)
        for k in range(K):
            w_p = w_p.at[k * f_pad:k * f_pad + f_in, :f_out].set(
                w[k * f_in:(k + 1) * f_in, :])
        w_stack.append(w_p)
        b_stack.append(jnp.zeros((1, f_pad), jnp.float32).at[:, :f_out].set(b))
    w_stack = jnp.stack(w_stack).astype(jnp.bfloat16)   # [L, K*f_pad, f_pad]
    b_stack = jnp.stack(b_stack)                        # [L, 1, f_pad]
    lhat_bf16 = lhat.astype(jnp.bfloat16)

    flops = num_layers * (2 * max(K - 1, 0) * N * N * f_pad
                          + 2 * K * N * f_pad * f_pad)
    bytes_accessed = (lhat_bf16.size * 2 + x_p.size * 4 + w_stack.size * 2
                      + b_stack.size * 4 + N * f_pad * 4)

    kernel = functools.partial(_agfnn_kernel, K=K, num_layers=num_layers,
                               f_pad=f_pad)
    out = pl.pallas_call(
        kernel,
        out_shape=jax.ShapeDtypeStruct((N, f_pad), jnp.float32),
        grid_spec=pltpu.PrefetchScalarGridSpec(
            num_scalar_prefetch=0,
            grid=(num_layers,),
            in_specs=[
                pl.BlockSpec((N, N), lambda l: (0, 0)),              # resident
                pl.BlockSpec((N, f_pad), lambda l: (0, 0)),          # resident
                pl.BlockSpec((1, K * f_pad, f_pad), lambda l: (l, 0, 0)),  # streamed
                pl.BlockSpec((1, 1, f_pad), lambda l: (l, 0, 0)),          # streamed
            ],
            out_specs=pl.BlockSpec((N, f_pad), lambda l: (0, 0)),
            scratch_shapes=[pltpu.VMEM((N, f_pad), jnp.float32)],    # h across layers
        ),
        compiler_params=pltpu.CompilerParams(
            dimension_semantics=("arbitrary",),          # layers are sequential
            vmem_limit_bytes=_vmem_limit_bytes(N, f_pad, K),
        ),
        cost_estimate=pl.CostEstimate(flops=flops, transcendentals=0,
                                      bytes_accessed=bytes_accessed),
    )(lhat_bf16, x_p, w_stack, b_stack)
    return out[:, :out_feats]


def agfnn_reference(lhat, features, params, *, K):
    """Pure-JAX f32 reference (same lambda_max=2 approximation)."""
    h = features
    num_layers = len(params)
    for i, (w, b) in enumerate(params):
        f_in = w.shape[0] // K
        ts = [h]
        if K > 1:
            ts.append(lhat @ h)
        for k in range(2, K):
            ts.append(2.0 * (lhat @ ts[-1]) - ts[-2])
        acc = jnp.zeros((h.shape[0], w.shape[1]), jnp.float32)
        for k in range(K):
            acc = acc + ts[k] @ w[k * f_in:(k + 1) * f_in, :]
        acc = acc + b
        h = jnp.maximum(acc, 0.0) if i != num_layers - 1 else acc
    return h


def make_params(key, in_feats, hidden_size, out_feats, K, num_layers):
    """Deterministic synthetic parameter init (shapes match ChebConv's Linear)."""
    dims = [in_feats] + [hidden_size] * (num_layers - 1) + [out_feats]
    params = []
    for i in range(num_layers):
        f_in, f_out = dims[i], dims[i + 1]
        key, kw, kb = jax.random.split(key, 3)
        scale = 1.0 / jnp.sqrt(jnp.float32(K * f_in))
        w = jax.random.uniform(kw, (K * f_in, f_out), jnp.float32,
                               minval=-scale, maxval=scale)
        b = jax.random.uniform(kb, (1, f_out), jnp.float32,
                               minval=-scale, maxval=scale)
        params.append((w, b))
    return params


def make_graph_lhat(key, n_nodes):
    """Random symmetric graph -> L_hat = -D^{-1/2} A D^{-1/2} (lambda_max=2)."""
    a = (jax.random.uniform(key, (n_nodes, n_nodes)) < 0.3).astype(jnp.float32)
    a = jnp.maximum(a, a.T)
    a = a * (1.0 - jnp.eye(n_nodes, dtype=jnp.float32))   # no self loops
    deg = jnp.maximum(a.sum(axis=1), 1.0)
    d_inv_sqrt = 1.0 / jnp.sqrt(deg)
    a_hat = a * d_inv_sqrt[:, None] * d_inv_sqrt[None, :]
    return -a_hat                                          # L - I with lambda_max=2


if __name__ == "__main__":
    # Small config: N=16 nodes, in_feats=8, hidden=32, out_feats=8, K=3, 3 layers.
    N, IN_FEATS, HIDDEN, OUT_FEATS, K, NUM_LAYERS = 16, 8, 32, 8, 3, 3

    key = jax.random.PRNGKey(0)
    k_graph, k_feat, k_param = jax.random.split(key, 3)

    lhat = make_graph_lhat(k_graph, N)                      # [N, N]
    features = jax.random.normal(k_feat, (N, IN_FEATS), jnp.float32)
    params = make_params(k_param, IN_FEATS, HIDDEN, OUT_FEATS, K, NUM_LAYERS)

    out = agfnn_forward(lhat, features, params, K=K)
    out = jax.block_until_ready(out)

    assert out.shape == (N, OUT_FEATS), out.shape
    assert jnp.all(jnp.isfinite(out))

    # Tolerance check against an f32 reference (kernel uses bf16 MXU operands).
    ref = agfnn_reference(lhat, features, params, K=K)
    assert jnp.allclose(out, ref, rtol=5e-2, atol=5e-2), (
        float(jnp.max(jnp.abs(out - ref))))

    print("KERNEL_OK")
</pallas_src>

<mosaic_0001>
module attributes {stable_mosaic.version = 11 : i64} {
  func.func @_agfnn_kernel(%arg0: i32, %arg1: memref<16x16xbf16, #tpu.memory_space<vmem>>, %arg2: memref<16x128xf32, #tpu.memory_space<vmem>>, %arg3: memref<1x384x128xbf16, #tpu.memory_space<vmem>>, %arg4: memref<1x1x128xf32, #tpu.memory_space<vmem>>, %arg5: memref<16x128xf32, #tpu.memory_space<vmem>>, %arg6: memref<16x128xf32, #tpu.memory_space<vmem>>) attributes {dimension_semantics = [#tpu.dimension_semantics<arbitrary>], iteration_bounds = array<i64: 3>, scalar_prefetch = 0 : i64, scratch_operands = 1 : i64, tpu.core_type = #tpu.core_type<tc>, window_params = [{pipeline_mode = #tpu.pipeline_mode<synchronous>, transform_indices = @transform_0, window_bounds = array<i64: 16, 16>}, {pipeline_mode = #tpu.pipeline_mode<synchronous>, transform_indices = @transform_1, window_bounds = array<i64: 16, 128>}, {transform_indices = @transform_2, window_bounds = array<i64: 1, 384, 128>}, {transform_indices = @transform_3, window_bounds = array<i64: 1, 1, 128>}, {pipeline_mode = #tpu.pipeline_mode<synchronous>, transform_indices = @transform_4, window_bounds = array<i64: 16, 128>}]} {
    %c0_i32 = arith.constant 0 : i32
    %0 = arith.cmpi eq, %arg0, %c0_i32 : i32
    %1 = arith.extui %0 : i1 to i32
    %c0_i32_0 = arith.constant 0 : i32
    %2 = arith.cmpi ne, %1, %c0_i32_0 : i32
    scf.if %2 {
      %c0_22 = arith.constant 0 : index
      %c0_23 = arith.constant 0 : index
      %35 = vector.load %arg2[%c0_22, %c0_23] : memref<16x128xf32, #tpu.memory_space<vmem>>, vector<16x128xf32>
      %c0_24 = arith.constant 0 : index
      %c0_25 = arith.constant 0 : index
      %36 = vector.load %arg6[%c0_24, %c0_25] : memref<16x128xf32, #tpu.memory_space<vmem>>, vector<16x128xf32>
      tpu.vector_store %arg6[%c0_24, %c0_25], %35 {strides = array<i32>} : memref<16x128xf32, #tpu.memory_space<vmem>>, vector<16x128xf32>,
    } else {
    }
    %c0 = arith.constant 0 : index
    %c0_1 = arith.constant 0 : index
    %3 = vector.load %arg1[%c0, %c0_1] : memref<16x16xbf16, #tpu.memory_space<vmem>>, vector<16x16xbf16>
    %c0_2 = arith.constant 0 : index
    %c0_3 = arith.constant 0 : index
    %4 = vector.load %arg6[%c0_2, %c0_3] : memref<16x128xf32, #tpu.memory_space<vmem>>, vector<16x128xf32>
    %5 = arith.truncf %4 : vector<16x128xf32> to vector<16x128xbf16>
    %c0_4 = arith.constant 0 : index
    %c0_5 = arith.constant 0 : index
    %c0_6 = arith.constant 0 : index
    %6 = vector.load %arg3[%c0_4, %c0_5, %c0_6] : memref<1x384x128xbf16, #tpu.memory_space<vmem>>, vector<1x128x128xbf16>
    %7 = vector.shape_cast %6 : vector<1x128x128xbf16> to vector<128x128xbf16>
    %cst = arith.constant dense<0.000000e+00> : vector<16x128xf32>
    %8 = tpu.matmul %5, %7, %cst {dimension_numbers = #tpu.dot_dimension_numbers<[1], [0], [0], [1], [0, 0, 1, 1], [], []>} : vector<16x128xbf16>, vector<128x128xbf16>, vector<16x128xf32> -> vector<16x128xf32>
    %cst_7 = arith.constant dense<0.000000e+00> : vector<16x128xf32>
    %9 = tpu.matmul %3, %5, %cst_7 {dimension_numbers = #tpu.dot_dimension_numbers<[1], [0], [0], [1], [0, 0, 1, 1], [], []>} : vector<16x16xbf16>, vector<16x128xbf16>, vector<16x128xf32> -> vector<16x128xf32>
    %10 = arith.truncf %9 : vector<16x128xf32> to vector<16x128xbf16>
    %c0_8 = arith.constant 0 : index
    %c128 = arith.constant 128 : index
    %c0_9 = arith.constant 0 : index
    %11 = vector.load %arg3[%c0_8, %c128, %c0_9] : memref<1x384x128xbf16, #tpu.memory_space<vmem>>, vector<1x128x128xbf16>
    %12 = vector.shape_cast %11 : vector<1x128x128xbf16> to vector<128x128xbf16>
    %cst_10 = arith.constant dense<0.000000e+00> : vector<16x128xf32>
    %13 = tpu.matmul %10, %12, %cst_10 {dimension_numbers = #tpu.dot_dimension_numbers<[1], [0], [0], [1], [0, 0, 1, 1], [], []>} : vector<16x128xbf16>, vector<128x128xbf16>, vector<16x128xf32> -> vector<16x128xf32>
    %14 = arith.addf %8, %13 : vector<16x128xf32>
    %cst_11 = arith.constant 2.000000e+00 : f32
    %15 = vector.broadcast %cst_11 : f32 to vector<16x128xf32>
    %16 = arith.mulf %9, %15 : vector<16x128xf32>
    %17 = arith.truncf %16 : vector<16x128xf32> to vector<16x128xbf16>
    %cst_12 = arith.constant dense<0.000000e+00> : vector<16x128xf32>
    %18 = tpu.matmul %3, %17, %cst_12 {dimension_numbers = #tpu.dot_dimension_numbers<[1], [0], [0], [1], [0, 0, 1, 1], [], []>} : vector<16x16xbf16>, vector<16x128xbf16>, vector<16x128xf32> -> vector<16x128xf32>
    %19 = arith.subf %18, %4 : vector<16x128xf32>
    %20 = arith.truncf %19 : vector<16x128xf32> to vector<16x128xbf16>
    %c0_13 = arith.constant 0 : index
    %c256 = arith.constant 256 : index
    %c0_14 = arith.constant 0 : index
    %21 = vector.load %arg3[%c0_13, %c256, %c0_14] : memref<1x384x128xbf16, #tpu.memory_space<vmem>>, vector<1x128x128xbf16>
    %22 = vector.shape_cast %21 : vector<1x128x128xbf16> to vector<128x128xbf16>
    %cst_15 = arith.constant dense<0.000000e+00> : vector<16x128xf32>
    %23 = tpu.matmul %20, %22, %cst_15 {dimension_numbers = #tpu.dot_dimension_numbers<[1], [0], [0], [1], [0, 0, 1, 1], [], []>} : vector<16x128xbf16>, vector<128x128xbf16>, vector<16x128xf32> -> vector<16x128xf32>
    %24 = arith.addf %14, %23 : vector<16x128xf32>
    %c0_16 = arith.constant 0 : index
    %c0_17 = arith.constant 0 : index
    %c0_18 = arith.constant 0 : index
    %25 = vector.load %arg4[%c0_16, %c0_17, %c0_18] : memref<1x1x128xf32, #tpu.memory_space<vmem>>, vector<1x1x128xf32>
    %26 = vector.shape_cast %25 : vector<1x1x128xf32> to vector<1x128xf32>
    %27 = vector.broadcast %26 : vector<1x128xf32> to vector<16x128xf32>
    %28 = arith.addf %24, %27 : vector<16x128xf32>
    %c2_i32 = arith.constant 2 : i32
    %29 = arith.cmpi ne, %arg0, %c2_i32 : i32
    %30 = arith.extui %29 : i1 to i32
    %c0_i32_19 = arith.constant 0 : i32
    %31 = arith.cmpi ne, %30, %c0_i32_19 : i32
    scf.if %31 {
      %cst_22 = arith.constant 0.000000e+00 : f32
      %35 = vector.broadcast %cst_22 : f32 to vector<16x128xf32>
      %36 = arith.maximumf %28, %35 : vector<16x128xf32>
      %c0_23 = arith.constant 0 : index
      %c0_24 = arith.constant 0 : index
      %37 = vector.load %arg6[%c0_23, %c0_24] : memref<16x128xf32, #tpu.memory_space<vmem>>, vector<16x128xf32>
      tpu.vector_store %arg6[%c0_23, %c0_24], %36 {strides = array<i32>} : memref<16x128xf32, #tpu.memory_space<vmem>>, vector<16x128xf32>,
    } else {
    }
    %c2_i32_20 = arith.constant 2 : i32
    %32 = arith.cmpi eq, %arg0, %c2_i32_20 : i32
    %33 = arith.extui %32 : i1 to i32
    %c0_i32_21 = arith.constant 0 : i32
    %34 = arith.cmpi ne, %33, %c0_i32_21 : i32
    scf.if %34 {
      %c0_22 = arith.constant 0 : index
      %c0_23 = arith.constant 0 : index
      %35 = vector.load %arg5[%c0_22, %c0_23] : memref<16x128xf32, #tpu.memory_space<vmem>>, vector<16x128xf32>
      tpu.vector_store %arg5[%c0_22, %c0_23], %28 {strides = array<i32>} : memref<16x128xf32, #tpu.memory_space<vmem>>, vector<16x128xf32>,
    } else {
    }
    return
  }
  func.func @transform_0(%arg0: i32) -> (i32, i32) {
    %c0_i32 = arith.constant 0 : i32
    %c0_i32_0 = arith.constant 0 : i32
    %c0_i32_1 = arith.constant 0 : i32
    return %c0_i32, %c0_i32_0 : i32, i32
  }
  func.func @transform_1(%arg0: i32) -> (i32, i32) {
    %c0_i32 = arith.constant 0 : i32
    %c0_i32_0 = arith.constant 0 : i32
    %c0_i32_1 = arith.constant 0 : i32
    return %c0_i32, %c0_i32_0 : i32, i32
  }
  func.func @transform_2(%arg0: i32) -> (i32, i32, i32) {
    %c0_i32 = arith.constant 0 : i32
    %c0_i32_0 = arith.constant 0 : i32
    %c0_i32_1 = arith.constant 0 : i32
    return %arg0, %c0_i32, %c0_i32_0 : i32, i32, i32
  }
  func.func @transform_3(%arg0: i32) -> (i32, i32, i32) {
    %c0_i32 = arith.constant 0 : i32
    %c0_i32_0 = arith.constant 0 : i32
    %c0_i32_1 = arith.constant 0 : i32
    return %arg0, %c0_i32, %c0_i32_0 : i32, i32, i32
  }
  func.func @transform_4(%arg0: i32) -> (i32, i32) {
    %c0_i32 = arith.constant 0 : i32
    %c0_i32_0 = arith.constant 0 : i32
    %c0_i32_1 = arith.constant 0 : i32
    return %c0_i32, %c0_i32_0 : i32, i32
  }
}

</mosaic_0001>

<bundles_post_ra>
// kernel: tpu_custom_call.1
= control target key start
LH: loop header
LB: loop body
LE: loop exit
PB: predicated region body
PF: predicated region fallthrough
CT: control target
= control target key end

     0   :  { %9 = vsyncpa [#allocation4], 0  ;;  %s1530_s0 = inlined_call_operand.hbm [shape: bf16[16,16], index: 0, kind: input, shape index: {}]   ;;  %s1531_s1 = inlined_call_operand.hbm [shape: f32[16,128], index: 1, kind: input, shape index: {}]   ;;  %s1532_s2 = inlined_call_operand.hbm [shape: bf16[3,384,128], index: 2, kind: input, shape index: {}]   ;;  %s1533_s3 = inlined_call_operand.vmem [shape: f32[3,1,128], index: 3, kind: input, shape index: {}]   ;;  %s1534_s4 = inlined_call_operand.hbm [shape: f32[16,128], index: 4, kind: output, shape index: {}]  }
   0x1   :  { %10 = vsyncpa [#allocation7], 0 }
   0x2   :  { %11 = vsyncpa [#allocation5], 0  ;;  %s1231_s15 = smov 0   ;;  %s1233_s16 = smov 0  }
   0x3   :  { %s1235_s17 = smov 0   ;;  %s1237_s18 = smov 0  }
   0x4 LB: > { %s1250_s19 = sadd.s32 4294967295, %s1192_s18   ;;  %s1253_s20 = sadd.s32 1, %s1192_s18   ;;  %s1192_s18 = sphi %s1237_s18, %s1555_s18   ;;  %s1188_s17 = sphi %s1235_s17, %s1554_s17   ;;  %s1184_s16 = sphi %s1233_s16, %s1553_s16   ;;  %s1180_s15 = sphi %s1231_s15, %s1552_s15  }
   0x5   : > { %s63_s21 = ssub.s32 %s1192_s18, %s1253_s20  ;;  %s66_s22 = sadd.s32 1, %s1188_s17 }
   0x6   : > { %p64_p0 = scmp.eq.s32.totalorder %s63_s21, 0  ;;  %p73_p1 = scmp.ne.s32.totalorder %s1188_s17, %s1184_s16 }
   0x7   : > { %p74_p2 = scmp.eq.s32.totalorder %s1192_s18, 0  ;;  %p79_p3 = scmp.ne.s32.totalorder %s1184_s16, %s1180_s15 }
   0x8   : > { %s1263_s23 = scalar_select %p64_p0, %s1188_s17, %s66_s22  }
   0x9   : > { %p1265_p4 = por %p74_p2, %p73_p1  ;;  %p1535_p5 = scmp.eq.s32.totalorder %s1250_s19, 0 }
   0xa   : > { %p785_p6 = scmp.ge.s32.totalorder %s1192_s18, 1  ;;  %p137_p7 = scmp.lt.s32.totalorder %s1192_s18, 4 }
   0xb   : > { %p1274_p8 = por %p1535_p5, %p79_p3  ;;  %s1194_s27 = smov [#allocation3]  }
   0xc   : > { %p1279_p10 = pnand %p785_p6, %p137_p7  ;;  %s149_s28 = sshll.u32 %s1194_s27, 4  ;;  %s150_s28 = int_to_ptr.vmem [resolvable:$true] %s149_s28 }
   0xd   : > { %s1540_s25 = scalar_select %p1274_p8, 1, 0 }
   0xe   : > { %s1541_s26 = scalar_select %p1279_p10, 1, 0 }
   0xf   : > { %p948_p11 = pneg %p1279_p10  ;;  %p961_p13 = scmp.lt.s32.totalorder %s1192_s18, 3 }
  0x10   : > { %s1034_s7 = scalar_lea.hbm %s1530_s0, 128 }
  0x11   : > { %p1287_p12 = pnand %p948_p11, %p1535_p5  ;;  %p1294_p0 = pnand %p961_p13, %p1265_p4 }
  0x12   : > { %p1035_p1 = scmp.ne.s32.totalorder %s1530_s0, %s1034_s7  ;;  %p1041_p4 = scmp.lt.u32.totalorder %s1034_s7, %s1530_s0 }
  0x13   : > { %s1543_s30 = scalar_select %p1294_p0, 1, 0 }
  0x14   : > { %p1036_p2 = pneg %p1287_p12 }
  0x16   : > { %p1037_p3 = pnand %p1036_p2, %p1035_p1 }
  0x18   : > { %p1038_p6 = pneg %p1037_p3 }
  0x1a   : > { %p1043_p7 = pnand %p1041_p4, %p1038_p6 }
  0x1c   : > { %1046 = shalt.err (!%p1043_p7)
}
  0x1d   : > { %s1047_s12 = scalar_lea.vmem %s150_s28, 128  ;;  %p1055_p5 = scmp.lt.s32.totalorder %s150_s28, %s150_s28 }
  0x1e   : > { %p1048_p11 = scmp.ne.s32.totalorder %s150_s28, %s1047_s12  ;;  %p1056_p8 = scmp.lt.s32.totalorder %s1047_s12, %s1047_s12 }
  0x20   : > { %p1050_p13 = pnand %p1048_p11, %p1036_p2  ;;  %p1057_p10 = por %p1056_p8, %p1055_p5 }
  0x22   : > { %p1051_p9 = pneg %p1050_p13 }
  0x24   : > { %p1058_p0 = pnand %p1057_p10, %p1051_p9 }
  0x26   : > { %1061 = shalt.err (!%p1058_p0)
}
  0x27   : > { %s1195_s13 = smov 64   ;;  %s1196_s14 = smov 4  }
  0x28   : > { %951 = dma.hbm_to_vmem [thread:$0]  (!%p1287_p12), %s1530_s0, 128, %s150_s28, [#allocation4], %s1195_s13, %s1195_s13, %s1196_s14  }
  0x29   : > { %s1197_s22 = smov [#allocation6]   ;;  %s1062_s6 = scalar_lea.hbm %s1531_s1, 256 }
  0x2a   : > { %s162_s24 = sshll.u32 %s1197_s22, 4  ;;  %p1063_p5 = scmp.ne.s32.totalorder %s1531_s1, %s1062_s6  ;;  %s163_s24 = int_to_ptr.vmem [resolvable:$true] %s162_s24 }
  0x2b   : > { %p1069_p10 = scmp.lt.u32.totalorder %s1062_s6, %s1531_s1 }
  0x2c   : > { %p1065_p8 = pnand %p1063_p5, %p1036_p2 }
  0x2e   : > { %p1066_p9 = pneg %p1065_p8 }
  0x30   : > { %p1071_p0 = pnand %p1069_p10, %p1066_p9 }
  0x32   : > { %1074 = shalt.err (!%p1071_p0)
}
  0x33   : > { %s1075_s28 = scalar_lea.vmem %s163_s24, 256  ;;  %p1083_p4 = scmp.lt.s32.totalorder %s163_s24, %s163_s24 }
  0x34   : > { %p1076_p1 = scmp.ne.s32.totalorder %s163_s24, %s1075_s28  ;;  %p1084_p7 = scmp.lt.s32.totalorder %s1075_s28, %s1075_s28 }
  0x36   : > { %p1078_p3 = pnand %p1076_p1, %p1036_p2  ;;  %p1085_p11 = por %p1084_p7, %p1083_p4 }
  0x38   : > { %p1079_p6 = pneg %p1078_p3 }
  0x3a   : > { %p1086_p13 = pnand %p1085_p11, %p1079_p6 }
  0x3c   : > { %1089 = shalt.err (!%p1086_p13)
}
  0x3d   : > { %s1198_s11 = smov 128   ;;  %s1199_s12 = smov 8  }
  0x3e   : > { %954 = dma.hbm_to_vmem [thread:$0]  (!%p1287_p12), %s1531_s1, 256, %s163_s24, [#allocation7], %s1198_s11, %s1198_s11, %s1199_s12  }
  0x3f   : > { %s176_s22 = sand.u32 1, %s1192_s18   ;;  %s178_s27 = sand.u32 1, %s1188_s17  }
  0x40   : > { %s931_s5 = smul.u32 192, %s178_s27  ;;  %s1353_s29 = scalar_lea.sflag [#allocation4], %s176_s22 }
  0x41   : > { %s932_s6 = smul.u32 3072, %s1192_s18  ;;  %p1544_p2 = scmp.ne.s32.totalorder %s1543_s30, 0 }
  0x42   : > { %s180_s10 = scalar_lea.vmem [#allocation8], %s931_s5  ;;  %s1095_s12 = scalar_lea.hbm %s1532_s2, 9216 }
  0x43   : > { %s1349_s9 = scalar_lea.hbm %s1532_s2, %s932_s6  ;;  %s187_s28 = sshll.u32 %s180_s10, 4  ;;  %s1351_s28 = int_to_ptr.vmem [resolvable:$true] %s187_s28 }
  0x44   : > { %s1090_s24 = scalar_lea.hbm %s1349_s9, 3072  ;;  %p1092_p5 = pneg %p1544_p2 }
  0x45   : > { %p1091_p12 = scmp.ne.s32.totalorder %s1349_s9, %s1090_s24  ;;  %p1096_p10 = scmp.lt.u32.totalorder %s1349_s9, %s1532_s2 }
  0x46   : > { %p1097_p0 = scmp.lt.u32.totalorder %s1095_s12, %s1090_s24  ;;  %p1099_p3 = scmp.lt.u32.totalorder %s1090_s24, %s1349_s9 }
  0x47   : > { %p1093_p8 = pnand %p1092_p5, %p1091_p12 }
  0x48   : > { %p1098_p1 = por %p1097_p0, %p1096_p10 }
  0x49   : > { %p1094_p9 = pneg %p1093_p8 }
  0x4a   : > { %p1100_p6 = por %p1099_p3, %p1098_p1 }
  0x4c   : > { %p1101_p4 = pnand %p1100_p6, %p1094_p9 }
  0x4e   : > { %1104 = shalt.err (!%p1101_p4)
}
  0x4f   : > { %s1105_s22 = scalar_lea.vmem %s1351_s28, 3072  ;;  %s1200_s27 = smov [#allocation8]  }
  0x50   : > { %p1106_p7 = scmp.ne.s32.totalorder %s1351_s28, %s1105_s22  ;;  %s1110_s5 = sshll.u32 %s1200_s27, 4  ;;  %s1111_s5 = int_to_ptr.vmem [resolvable:$false] %s1110_s5 }
  0x51   : > { %s1112_s6 = scalar_lea.vmem %s1111_s5, 6144  ;;  %p1113_p12 = scmp.lt.s32.totalorder %s1351_s28, %s1111_s5 }
  0x52   : > { %p1108_p11 = pnand %p1106_p7, %p1092_p5  ;;  %p1114_p8 = scmp.lt.s32.totalorder %s1112_s6, %s1105_s22 }
  0x54   : > { %p1109_p13 = pneg %p1108_p11  ;;  %p1115_p10 = por %p1114_p8, %p1113_p12 }
  0x56   : > { %p1116_p0 = pnand %p1115_p10, %p1109_p13 }
  0x58   : > { %1119 = shalt.err (!%p1116_p0)
}
  0x59   : > { %958 = dma.hbm_to_vmem [thread:$0]  (!%p1544_p2), %s1349_s9, 3072, %s1351_s28, %s1353_s29, %s1195_s13, %s1195_s13, %s1196_s14  }
  0x5a   : > { %p1545_p5 = scmp.ne.s32.totalorder %s1541_s26, 0 }
  0x5b   : > { %p1546_p9 = scmp.eq.s32.totalorder (!%p1545_p5), %s1250_s19, 0 }
  0x5c   : > { %205 = sbr.rel (%p1545_p5) target bundleno = 823 (0x337), region = 36 }
  0x63   : > { %1163 = dma.done.wait (%p1546_p9), [#allocation4], 128   ;;  %p1547_p1 = pmov %p1546_p9 }
  0x65   : > { %1165 = vsyncadd (%p1547_p1), [#allocation4], 4294967168  ;;  %p1548_p3 = pmov %p1547_p1 }
  0x66   : > { %p1549_p6 = pmov %p1547_p1 }
  0x67   : > { %1167 = dma.done.wait (%p1548_p3), [#allocation7], 256  }
  0x68   : > { %1169 = vsyncadd (%p1549_p6), [#allocation7], 4294967040  ;;  %s215_s30 = sand.u32 1, %s1250_s19   ;;  %s217_s13 = sand.u32 1, %s1184_s16  }
  0x69   : > { %s933_s14 = smul.u32 192, %s217_s13  ;;  %s216_s26 = scalar_lea.sflag [#allocation4], %s215_s30 }
  0x6a   : > { %p1550_p2 = scmp.ne.s32.totalorder %s1540_s25, 0 }
  0x6b   : > { %s1396_s7 = scalar_lea.vmem [#allocation8], %s933_s14 }
  0x6c   : > { %1171 = dma.done.wait (%p1550_p2), %s216_s26, 3072  }
  0x6d   : > { %1173 = vsyncadd (%p1550_p2), %s216_s26, 4294964224  ;;  %p242_p4 = scmp.lt.s32.totalorder %s1250_s19, 2  ;;  %p1551_p7 = scmp.ne.s32.totalorder %s1250_s19, 0 }
  0x6e   : > { %v250_v0 = vld [vmem:[#allocation6] sm:$0xff] (!%p1551_p7)  ;;  %v251_v1 = vld [vmem:[#allocation6 + $0x8] sm:$0xff] (!%p1551_p7) }
  0x6f   : > { %s1404_s8 = scalar_select %p242_p4, %s1250_s19, 2 }
  0x70   : > { %249 = sbr.rel (%p1551_p7) target bundleno = 119 (0x77), region = 52  ;;  %252 = vst [vmem:[#allocation2] sm:$0xff] (!%p1551_p7), %v250_v0  ;;  %253 = vst [vmem:[#allocation2 + $0x8] sm:$0xff] (!%p1551_p7), %v251_v1 }
  0x71   : > { %s244_s28 = scalar_lea.vmem %s1533_s3, %s1404_s8 }
  0x77 PF: > { %v1412_v2 = vld [vmem:[#allocation2] sm:$0xff]  ;;  %v1414_v3 = vld [vmem:[#allocation2 + $0x8] sm:$0xff]  ;;  %v1201_v4 = vmov 0.0   ;;  %vm1202_vm0 = vmmov 0   ;;  %v1421_v6 = vld [vmem:[#allocation3] sm:$0xff]   ;;  %vm280_vm1 = vcmask 130048  }
  0x78   : > { %859 = vmatprep.subr.bf16.mxu1 %v1201_v4  ;;  %v258_v5 = vpack.c.bf16 %v1414_v3, %v1412_v2  ;;  %861 = vmatprep.mubr.msk.bf16.mxu1 %vm1202_vm0, %v1201_v4  ;;  %v1010_v7 = vld [vmem:[%s1396_s7 + $0x40] sm:$0xff]   ;;  %v1013_v9 = vld [vmem:[%s1396_s7 + $0x8] sm:$0xff]   ;;  %v1015_v11 = vld [vmem:[%s1396_s7 + $0x10] sm:$0xff]   ;;  %p822_p11 = scmp.eq.s32.totalorder %s1250_s19, 2 }
  0x79   : > { %885 = vmatprep.subr.bf16.mxu0 %v1201_v4  ;;  %901 = vmatprep.mubr.msk.bf16.mxu0 %vm1202_vm0, %v1201_v4  ;;  %v1011_v8 = vld [vmem:[%s1396_s7] sm:$0xff]   ;;  %v1012_v10 = vld [vmem:[%s1396_s7 + $0x48] sm:$0xff]   ;;  %v1014_v12 = vld [vmem:[%s1396_s7 + $0x50] sm:$0xff]  }
  0x7a   : > { %860 = vmatpush3.bf16.msra.mxu1 %v258_v5  ;;  %886 = vmatpush3.bf16.msra.mxu0 %v1011_v8  ;;  %v1017_v13 = vld [vmem:[%s1396_s7 + $0x18] sm:$0xff]   ;;  %v1019_v15 = vld [vmem:[%s1396_s7 + $0x20] sm:$0xff]   ;;  %v1021_v17 = vld [vmem:[%s1396_s7 + $0x28] sm:$0xff]  }
  0x7b   : > { %865 = vmatprep.subr.bf16.mxu1 %v1201_v4  ;;  %887 = vmatprep.subr.bf16.mxu0 %v1201_v4  ;;  %v1016_v14 = vld [vmem:[%s1396_s7 + $0x58] sm:$0xff]   ;;  %v1018_v16 = vld [vmem:[%s1396_s7 + $0x60] sm:$0xff]   ;;  %v1020_v18 = vld [vmem:[%s1396_s7 + $0x68] sm:$0xff]  }
  0x7c   : > { %v1023_v19 = vld [vmem:[%s1396_s7 + $0x30] sm:$0xff]   ;;  %v1024_v21 = vld [vmem:[%s1396_s7 + $0x78] sm:$0xff]   ;;  %v1026_v23 = vld [vmem:[%s1396_s7 + $0x80] sm:$0xff]  }
  0x7d   : > { %862 = vmatmul.mubr.msk.bf16.vlgmr.msra.gmra.mrb[0].mxu1 %vm280_vm1, %v1421_v6  ;;  %v1022_v20 = vld [vmem:[%s1396_s7 + $0x70] sm:$0xff]   ;;  %v1025_v22 = vld [vmem:[%s1396_s7 + $0x38] sm:$0xff]   ;;  %v1027_v24 = vld [vmem:[%s1396_s7 + $0x88] sm:$0xff]  }
  0x7e   : > { %866 = vmatpush3.bf16.msra.mxu1 %v1010_v7  ;;  %881 = vmatprep.mubr.msk.bf16.mxu1 %vm1202_vm0, %v1201_v4  ;;  %v1028_v25 = vld [vmem:[%s1396_s7 + $0x90] sm:$0xff]   ;;  %v1029_v26 = vld [vmem:[%s1396_s7 + $0x98] sm:$0xff]   ;;  %v1030_v35 = vld [vmem:[%s1396_s7 + $0xa0] sm:$0xff]  }
  0x7f   : > { %867 = vmatprep.subr.bf16.mxu1 %v1201_v4  ;;  %888 = vmatpush3.bf16.msra.mxu0 %v1013_v9  ;;  %v1031_v39 = vld [vmem:[%s1396_s7 + $0xa8] sm:$0xff]   ;;  %v1032_v41 = vld [vmem:[%s1396_s7 + $0xb0] sm:$0xff]   ;;  %v1033_v42 = vld [vmem:[%s1396_s7 + $0xb8] sm:$0xff]  }
  0x80   : > { %889 = vmatprep.subr.bf16.mxu0 %v1201_v4  ;;  %v821_v57 = vld [vmem:[%s244_s28] ss:$0 sm:$0xff] }
  0x82   : > { %868 = vmatpush3.bf16.msra.mxu1 %v1012_v10 }
  0x83   : > { %869 = vmatprep.subr.bf16.mxu1 %v1201_v4  ;;  %890 = vmatpush3.bf16.msra.mxu0 %v1015_v11 }
  0x84   : > { %891 = vmatprep.subr.bf16.mxu0 %v1201_v4 }
  0x86   : > { %870 = vmatpush3.bf16.msra.mxu1 %v1014_v12 }
  0x87   : > { %871 = vmatprep.subr.bf16.mxu1 %v1201_v4  ;;  %892 = vmatpush3.bf16.msra.mxu0 %v1017_v13 }
  0x88   : > { %893 = vmatprep.subr.bf16.mxu0 %v1201_v4 }
  0x8a   : > { %872 = vmatpush3.bf16.msra.mxu1 %v1016_v14 }
  0x8b   : > { %873 = vmatprep.subr.bf16.mxu1 %v1201_v4  ;;  %894 = vmatpush3.bf16.msra.mxu0 %v1019_v15 }
  0x8c   : > { %895 = vmatprep.subr.bf16.mxu0 %v1201_v4 }
  0x8e   : > { %874 = vmatpush3.bf16.msra.mxu1 %v1018_v16 }
  0x8f   : > { %875 = vmatprep.subr.bf16.mxu1 %v1201_v4  ;;  %896 = vmatpush3.bf16.msra.mxu0 %v1021_v17 }
  0x90   : > { %897 = vmatprep.subr.bf16.mxu0 %v1201_v4 }
  0x92   : > { %876 = vmatpush3.bf16.msra.mxu1 %v1020_v18 }
  0x93   : > { %877 = vmatprep.subr.bf16.mxu1 %v1201_v4  ;;  %898 = vmatpush3.bf16.msra.mxu0 %v1023_v19 }
  0x94   : > { %899 = vmatprep.subr.bf16.mxu0 %v1201_v4 }
  0x96   : > { %878 = vmatpush3.bf16.msra.mxu1 %v1022_v20 }
  0x97   : > { %879 = vmatprep.subr.bf16.mxu1 %v1201_v4  ;;  %900 = vmatpush3.bf16.msra.mxu0 %v1025_v22 }
  0x98   : > { %911 = vmatprep.subr.bf16.mxu0 %v1201_v4 }
  0x9a   : > { %880 = vmatpush3.bf16.msra.mxu1 %v1024_v21  ;;  %902 = vmatmul.mubr.bf16.vlgmr.msra.gmra.mrb[0].mxu0 %v258_v5 }
  0x9b   : > { %905 = vmatprep.subr.bf16.mxu1 %v1201_v4  ;;  %927 = vmatprep.mubr.msk.bf16.mxu0 %vm1202_vm0, %v1201_v4 }
  0x9c   : > { %912 = vmatpush3.bf16.msra.mxu0 %v1026_v23 }
  0x9d   : > { %913 = vmatprep.subr.bf16.mxu0 %v1201_v4 }
  0xa0   : > { %914 = vmatpush3.bf16.msra.mxu0 %v1027_v24 }
  0xa1   : > { %915 = vmatprep.subr.bf16.mxu0 %v1201_v4 }
  0xa4   : > { %916 = vmatpush3.bf16.msra.mxu0 %v1028_v25 }
  0xa5   : > { %917 = vmatprep.subr.bf16.mxu0 %v1201_v4 }
  0xa8   : > { %918 = vmatpush3.bf16.msra.mxu0 %v1029_v26 }
  0xa9   : > { %919 = vmatprep.subr.bf16.mxu0 %v1201_v4 }
  0xac   : > { %920 = vmatpush3.bf16.msra.mxu0 %v1030_v35 }
  0xad   : > { %921 = vmatprep.subr.bf16.mxu0 %v1201_v4 }
  0xb0   : > { %922 = vmatpush3.bf16.msra.mxu0 %v1031_v39 }
  0xb1   : > { %923 = vmatprep.subr.bf16.mxu0 %v1201_v4 }
  0xb4   : > { %924 = vmatpush3.bf16.msra.mxu0 %v1032_v41 }
  0xb5   : > { %925 = vmatprep.subr.bf16.mxu0 %v1201_v4 }
  0xb8   : > { %926 = vmatpush3.bf16.msra.mxu0 %v1033_v42 }
 0x150   : > { %v318_v27 = vpop.f32.mrb[0].mxu1 }
 0x151   : > { %v863_v28 = vpop.f32.mrb[1].mxu1  ;;  %v520_v30 = vmul.f32 2.0, %v318_v27 }
 0x152   : > { %v321_v29 = vpop.f32.mrb[2].mxu1 }
 0x153   : > { %v325_v31 = vpack.c.bf16 %v321_v29, %v318_v27  ;;  %v521_v32 = vmul.f32 2.0, %v321_v29  ;;  %v864_v33 = vpop.f32.mrb[3].mxu1 }
 0x155   : > { %v522_v34 = vpack.c.bf16 %v521_v32, %v520_v30  ;;  %882 = vmatmul.mubr.bf16.vlgmr.msra.gmra.mrb[4].mxu1 %v325_v31 }
 0x156   : > { %907 = vmatprep.mubr.msk.bf16.mxu1 %vm1202_vm0, %v1201_v4 }
 0x157   : > { %906 = vmatpush3.bf16.msra.mxu1 %v522_v34 }
 0x15d   : > { %908 = vmatmul.mubr.msk.bf16.vlgmr.msra.gmra.mrb[8].mxu1 %vm280_vm1, %v1421_v6 }
 0x16d   : > { %v513_v36 = vpop.f32.mrb[0].mxu0 }
 0x16e   : > { %v903_v37 = vpop.f32.mrb[1].mxu0 }
 0x16f   : > { %v516_v38 = vpop.f32.mrb[2].mxu0 }
 0x170   : > { %v904_v40 = vpop.f32.mrb[3].mxu0 }
 0x228   : > { %v424_v43 = vpop.f32.mrb[4].mxu1 }
 0x229   : > { %v514_v44 = vadd.f32 %v513_v36, %v424_v43  ;;  %v883_v45 = vpop.f32.mrb[5].mxu1 }
 0x22a   : > { %v427_v46 = vpop.f32.mrb[6].mxu1 }
 0x22b   : > { %v517_v47 = vadd.f32 %v516_v38, %v427_v46  ;;  %v884_v48 = vpop.f32.mrb[7].mxu1 }
 0x230   : > { %v557_v49 = vpop.f32.mrb[8].mxu1 }
 0x231   : > { %v909_v50 = vpop.f32.mrb[9].mxu1  ;;  %v564_v52 = vsub.f32 %v557_v49, %v1412_v2 }
 0x232   : > { %v560_v51 = vpop.f32.mrb[10].mxu1 }
 0x233   : > { %v565_v53 = vsub.f32 %v560_v51, %v1414_v3  ;;  %v910_v54 = vpop.f32.mrb[11].mxu1 }
 0x235   : > { %v566_v55 = vpack.c.bf16 %v565_v53, %v564_v52 }
 0x237   : > { %928 = vmatmul.mubr.bf16.vlgmr.msra.gmra.mrb[4].mxu0 %v566_v55 }
 0x309   : > { %686 = sbr.rel (%p822_p11) target bundleno = 788 (0x314), region = 56 }
 0x30a   : > { %v665_v56 = vpop.f32.mrb[4].mxu0 }
 0x30b   : > { %v672_v58 = vadd.f32 %v665_v56, %v514_v44  ;;  %v929_v59 = vpop.f32.mrb[5].mxu0 }
 0x30c   : > { %v668_v60 = vpop.f32.mrb[6].mxu0 }
 0x30d   : > { %v681_v61 = vadd.f32 %v821_v57, %v672_v58  ;;  %v673_v62 = vadd.f32 %v668_v60, %v517_v47  ;;  %v930_v63 = vpop.f32.mrb[7].mxu0 }
 0x30f   : > { %v682_v0 = vadd.f32 %v821_v57, %v673_v62  ;;  %v687_v1 = vmax.f32 (!%p822_p11), %v681_v61, 0.0 }
 0x311   : > { %v688_v2 = vmax.f32 %v682_v0, 0.0  ;;  %689 = vst [vmem:[#allocation2] sm:$0xff] %v687_v1 }
 0x313   : > { %690 = vst [vmem:[#allocation2 + $0x8] sm:$0xff] %v688_v2 }
 0x314 PF: > { %p823_p13 = scmp.ne.s32.totalorder %s1250_s19, 2 }
 0x315   : > { %695 = vst [vmem:[#allocation9] sm:$0xff] (!%p823_p13), %v681_v61  ;;  %696 = vst [vmem:[#allocation9 + $0x8] sm:$0xff] (!%p823_p13), %v682_v0 }
 0x316   : > { %694 = sbr.rel (%p823_p13) target bundleno = 797 (0x31d), region = 60 }
 0x31d PF: > { %s1203_s24 = smov [#allocation9]  }
 0x31e   : > { %s703_s18 = sshll.u32 %s1203_s24, 4  ;;  %s704_s18 = int_to_ptr.vmem [resolvable:$true] %s703_s18 }
 0x31f   : > { %s1120_s11 = scalar_lea.vmem %s704_s18, 256  ;;  %p1127_p0 = scmp.lt.s32.totalorder %s704_s18, %s704_s18 }
 0x320   : > { %p1121_p12 = scmp.ne.s32.totalorder %s704_s18, %s1120_s11  ;;  %p1128_p5 = scmp.lt.s32.totalorder %s1120_s11, %s1120_s11 }
 0x322   : > { %p1122_p8 = pnand %p1121_p12, %p822_p11  ;;  %p1129_p9 = por %p1128_p5, %p1127_p0 }
 0x324   : > { %p1123_p10 = pneg %p1122_p8 }
 0x326   : > { %p1130_p1 = pnand %p1129_p9, %p1123_p10 }
 0x328   : > { %1133 = shalt.err (!%p1130_p1)
}
 0x329   : > { %s1134_s21 = scalar_lea.hbm %s1534_s4, 256 }
 0x32a   : > { %p1135_p3 = scmp.ne.s32.totalorder %s1534_s4, %s1134_s21  ;;  %p1140_p4 = scmp.lt.u32.totalorder %s1134_s21, %s1534_s4 }
 0x32c   : > { %p1136_p6 = pnand %p1135_p3, %p822_p11 }
 0x32e   : > { %p1137_p2 = pneg %p1136_p6 }
 0x330   : > { %p1142_p7 = pnand %p1140_p4, %p1137_p2 }
 0x332   : > { %1145 = shalt.err (!%p1142_p7)
}
 0x333   : > { %s1204_s30 = smov 128   ;;  %s1205_s13 = smov 8  }
 0x334   : > { %945 = dma.vmem_to_hbm [thread:$0]  (%p822_p11), %s704_s18, 256, %s1534_s4, [#allocation5], %s1204_s30, %s1204_s30, %s1205_s13  }
 0x335   : > { %1175 = dma.done.wait (%p822_p11), [#allocation5], 256  }
 0x336   : > { %1177 = vsyncadd (%p822_p11), [#allocation5], 4294967040 }
 0x337 PF: > { %p14_p13 = scmp.ge.s32.totalorder %s1253_s20, 5   ;;  %s1552_s15 = smov %s1184_s16 }
 0x338   : > { %s1553_s16 = smov %s1188_s17  ;;  %s1554_s17 = smov %s1263_s23 }
 0x339   : > { %s1555_s18 = smov %s1253_s20  ;;  %16 = sbr.rel (!%p14_p13) target bundleno = 4 (0x4), region = 95 }
 0x340   :  { %719 = vsyncpa [#allocation4], 1 }
 0x341   :  { %721 = vsyncpa [#allocation4 + $0x1], 1 }
 0x342   :  { %722 = vsyncpa [#allocation7], 1 }
 0x343   :  { %723 = vsyncpa [#allocation5], 1 }
 0x344   :  { %725 = vsyncpa [#allocation5 + $0x1], 1 }

</bundles_post_ra>
